<compile_context>
chip_gen: v7x
topology: tpu7x:2x2x1
jax: 0.10.0
libtpu: 0.0.40
codegen_flags: <defaults>
</compile_context>

<pallas_src>
import jax
import jax.numpy as jnp
from jax.experimental import pallas as pl
from jax.experimental.pallas import tpu as pltpu


def _disc_mlp_kernel(h_ref, y_ref, w1h_ref, w1y_ref, b1_ref, w2_ref, b2_ref, o_ref):
    # h_ref  : (TM, h_size)     y_ref  : (TM, y_size)
    # w1h_ref: (h_size, 64)     w1y_ref: (y_size, 64)    b1_ref: (1, 64)
    # w2_ref : (1, 64)          b2_ref : (1,) in SMEM
    # o_ref  : (TM, 1)
    # Fused concat: cat(h, y) @ w1  ==  h @ w1h + y @ w1y
    z1 = (
        jnp.dot(h_ref[...], w1h_ref[...], preferred_element_type=jnp.float32)
        + jnp.dot(y_ref[...], w1y_ref[...], preferred_element_type=jnp.float32)
        + b1_ref[...]
    )
    z1 = jnp.maximum(z1, 0.0)  # ReLU
    # Second linear (64 -> 1): N=1 matmul is ~0% MXU fill -> VPU mul + XLU reduce.
    z2 = jnp.sum(z1 * w2_ref[...], axis=-1, keepdims=True) + b2_ref[0]
    o_ref[...] = jax.nn.sigmoid(z2).astype(o_ref.dtype)


def discriminator_forward(h, y, params, *, tm=2048):
    """h: (B, S, h_size), y: (B, S, y_size) -> (B, S, 1)."""
    w1, b1, w2, b2 = params
    B, S, h_size = h.shape
    y_size = y.shape[-1]
    M = B * S

    # Flatten batch/seq (row-major reshape, no data movement) -- NO concat.
    h2 = h.reshape(M, h_size)
    y2 = y.reshape(M, y_size)

    # Split the first-layer weight so the concat fuses into the kernel.
    w1h = w1[:h_size]
    w1y = w1[h_size:]
    w2_row = w2.reshape(1, 64)
    b2_s = b2.reshape(1)

    # Row-tile size: capped by M; multiple of 8 when tiling.
    tm = int(min(tm, M))
    if tm < M:
        tm = max(8, (tm // 8) * 8)
    grid_m = pl.cdiv(M, tm)
    m_pad = grid_m * tm
    if m_pad != M:  # pad rows so the grid divides evenly (sliced off below)
        h2 = jnp.pad(h2, ((0, m_pad - M), (0, 0)))
        y2 = jnp.pad(y2, ((0, m_pad - M), (0, 0)))

    d_in = h_size + y_size
    cost = pl.CostEstimate(
        flops=2 * m_pad * d_in * 64 + 4 * m_pad * 64,
        transcendentals=m_pad,
        bytes_accessed=4 * (m_pad * (d_in + 1) + d_in * 64 + 2 * 64 + 1),
    )

    out = pl.pallas_call(
        _disc_mlp_kernel,
        out_shape=jax.ShapeDtypeStruct((m_pad, 1), jnp.float32),
        grid=(grid_m,),
        in_specs=[
            pl.BlockSpec((tm, h_size), lambda i: (i, 0)),
            pl.BlockSpec((tm, y_size), lambda i: (i, 0)),
            pl.BlockSpec((h_size, 64), lambda i: (0, 0)),
            pl.BlockSpec((y_size, 64), lambda i: (0, 0)),
            pl.BlockSpec((1, 64), lambda i: (0, 0)),
            pl.BlockSpec((1, 64), lambda i: (0, 0)),
            pl.BlockSpec(memory_space=pltpu.MemorySpace.SMEM),
        ],
        out_specs=pl.BlockSpec((tm, 1), lambda i: (i, 0)),
        compiler_params=pltpu.CompilerParams(
            dimension_semantics=("parallel",),
        ),
        cost_estimate=cost,
    )(h2, y2, w1h, w1y, b1, w2_row, b2_s)

    return out[:M].reshape(B, S, 1)


def init_params(key, h_size, y_size):
    """Deterministic synthetic init matching nn.Linear shapes:
       Linear(h_size+y_size, 64) and Linear(64, 1). Stored transposed for x @ W."""
    d_in = h_size + y_size
    k1, k2, k3, k4 = jax.random.split(key, 4)
    lim1 = 1.0 / jnp.sqrt(d_in)
    lim2 = 1.0 / jnp.sqrt(64.0)
    w1 = jax.random.uniform(k1, (d_in, 64), jnp.float32, -lim1, lim1)
    b1 = jax.random.uniform(k2, (1, 64), jnp.float32, -lim1, lim1)
    w2 = jax.random.uniform(k3, (64, 1), jnp.float32, -lim2, lim2)
    b2 = jax.random.uniform(k4, (1, 1), jnp.float32, -lim2, lim2)
    return (w1, b1, w2, b2)


def reference_forward(h, y, params):
    w1, b1, w2, b2 = params
    x = jnp.concatenate((h, y), axis=2)
    z1 = jnp.maximum(x @ w1 + b1[0], 0.0)
    z2 = z1 @ w2 + b2[0]
    return jax.nn.sigmoid(z2)


if __name__ == "__main__":
    B, S = 2, 8
    h_size, y_size = 32, 16

    key = jax.random.PRNGKey(0)
    kh, ky, kp = jax.random.split(key, 3)
    h = jax.random.normal(kh, (B, S, h_size), jnp.float32)
    y = jax.random.normal(ky, (B, S, y_size), jnp.float32)
    params = init_params(kp, h_size, y_size)

    out = discriminator_forward(h, y, params)
    out = jax.block_until_ready(out)

    ref = reference_forward(h, y, params)
    assert out.shape == (B, S, 1), out.shape
    assert jnp.allclose(out, ref, atol=1e-5, rtol=1e-5), "mismatch vs reference"

    # Second case exercising the row grid + padding path (M=520, TM=128 -> 5 tiles).
    B2, S2 = 4, 130
    h_b = jax.random.normal(jax.random.PRNGKey(1), (B2, S2, h_size), jnp.float32)
    y_b = jax.random.normal(jax.random.PRNGKey(2), (B2, S2, y_size), jnp.float32)
    out_b = jax.block_until_ready(discriminator_forward(h_b, y_b, params, tm=128))
    ref_b = reference_forward(h_b, y_b, params)
    assert out_b.shape == (B2, S2, 1), out_b.shape
    assert jnp.allclose(out_b, ref_b, atol=1e-5, rtol=1e-5), "mismatch vs reference (tiled)"

    print("KERNEL_OK")
</pallas_src>

<mosaic_0001>
module attributes {stable_mosaic.version = 11 : i64} {
  func.func @_disc_mlp_kernel(%arg0: i32, %arg1: memref<16x32xf32, #tpu.memory_space<vmem>>, %arg2: memref<16x16xf32, #tpu.memory_space<vmem>>, %arg3: memref<32x64xf32, #tpu.memory_space<vmem>>, %arg4: memref<16x64xf32, #tpu.memory_space<vmem>>, %arg5: memref<1x64xf32, #tpu.memory_space<vmem>>, %arg6: memref<1x64xf32, #tpu.memory_space<vmem>>, %arg7: memref<1xf32, #tpu.memory_space<smem>>, %arg8: memref<16x1xf32, #tpu.memory_space<vmem>>) attributes {dimension_semantics = [#tpu.dimension_semantics<parallel>], iteration_bounds = array<i64: 1>, scalar_prefetch = 0 : i64, scratch_operands = 0 : i64, tpu.core_type = #tpu.core_type<tc>, window_params = [{transform_indices = @transform_0, window_bounds = array<i64: 16, 32>}, {transform_indices = @transform_1, window_bounds = array<i64: 16, 16>}, {pipeline_mode = #tpu.pipeline_mode<synchronous>, transform_indices = @transform_2, window_bounds = array<i64: 32, 64>}, {pipeline_mode = #tpu.pipeline_mode<synchronous>, transform_indices = @transform_3, window_bounds = array<i64: 16, 64>}, {pipeline_mode = #tpu.pipeline_mode<synchronous>, transform_indices = @transform_4, window_bounds = array<i64: 1, 64>}, {pipeline_mode = #tpu.pipeline_mode<synchronous>, transform_indices = @transform_5, window_bounds = array<i64: 1, 64>}, {transform_indices = @transform_6, window_bounds = array<i64: 1>}, {transform_indices = @transform_7, window_bounds = array<i64: 16, 1>}]} {
    %c0 = arith.constant 0 : index
    %c0_0 = arith.constant 0 : index
    %0 = vector.load %arg1[%c0, %c0_0] : memref<16x32xf32, #tpu.memory_space<vmem>>, vector<16x32xf32>
    %c0_1 = arith.constant 0 : index
    %c0_2 = arith.constant 0 : index
    %1 = vector.load %arg3[%c0_1, %c0_2] : memref<32x64xf32, #tpu.memory_space<vmem>>, vector<32x64xf32>
    %cst = arith.constant dense<0.000000e+00> : vector<16x64xf32>
    %2 = tpu.matmul %0, %1, %cst {dimension_numbers = #tpu.dot_dimension_numbers<[1], [0], [0], [1], [0, 0, 1, 1], [], []>} : vector<16x32xf32>, vector<32x64xf32>, vector<16x64xf32> -> vector<16x64xf32>
    %c0_3 = arith.constant 0 : index
    %c0_4 = arith.constant 0 : index
    %3 = vector.load %arg2[%c0_3, %c0_4] : memref<16x16xf32, #tpu.memory_space<vmem>>, vector<16x16xf32>
    %c0_5 = arith.constant 0 : index
    %c0_6 = arith.constant 0 : index
    %4 = vector.load %arg4[%c0_5, %c0_6] : memref<16x64xf32, #tpu.memory_space<vmem>>, vector<16x64xf32>
    %cst_7 = arith.constant dense<0.000000e+00> : vector<16x64xf32>
    %5 = tpu.matmul %3, %4, %cst_7 {dimension_numbers = #tpu.dot_dimension_numbers<[1], [0], [0], [1], [0, 0, 1, 1], [], []>} : vector<16x16xf32>, vector<16x64xf32>, vector<16x64xf32> -> vector<16x64xf32>
    %6 = arith.addf %2, %5 : vector<16x64xf32>
    %c0_8 = arith.constant 0 : index
    %c0_9 = arith.constant 0 : index
    %7 = vector.load %arg5[%c0_8, %c0_9] : memref<1x64xf32, #tpu.memory_space<vmem>>, vector<1x64xf32>
    %8 = vector.broadcast %7 : vector<1x64xf32> to vector<16x64xf32>
    %9 = arith.addf %6, %8 : vector<16x64xf32>
    %cst_10 = arith.constant 0.000000e+00 : f32
    %10 = vector.broadcast %cst_10 : f32 to vector<16x64xf32>
    %11 = arith.maximumf %9, %10 : vector<16x64xf32>
    %c0_11 = arith.constant 0 : index
    %c0_12 = arith.constant 0 : index
    %12 = vector.load %arg6[%c0_11, %c0_12] : memref<1x64xf32, #tpu.memory_space<vmem>>, vector<1x64xf32>
    %13 = vector.broadcast %12 : vector<1x64xf32> to vector<16x64xf32>
    %14 = arith.mulf %11, %13 : vector<16x64xf32>
    %cst_13 = arith.constant dense<0.000000e+00> : vector<16xf32>
    %15 = vector.multi_reduction <add>, %14, %cst_13 [1] : vector<16x64xf32> to vector<16xf32>
    %16 = vector.shape_cast %15 : vector<16xf32> to vector<16x1xf32>
    %c0_14 = arith.constant 0 : index
    %17 = memref.load %arg7[%c0_14] : memref<1xf32, #tpu.memory_space<smem>>
    %18 = vector.broadcast %17 : f32 to vector<16x1xf32>
    %19 = arith.addf %16, %18 : vector<16x1xf32>
    %20 = arith.negf %19 : vector<16x1xf32>
    %21 = math.exp %20 : vector<16x1xf32>
    %cst_15 = arith.constant 1.000000e+00 : f32
    %22 = vector.broadcast %cst_15 : f32 to vector<16x1xf32>
    %23 = arith.addf %22, %21 : vector<16x1xf32>
    %24 = arith.divf %22, %23 : vector<16x1xf32>
    %c0_16 = arith.constant 0 : index
    %c0_17 = arith.constant 0 : index
    %25 = vector.load %arg8[%c0_16, %c0_17] : memref<16x1xf32, #tpu.memory_space<vmem>>, vector<16x1xf32>
    tpu.vector_store %arg8[%c0_16, %c0_17], %24 {strides = array<i32>} : memref<16x1xf32, #tpu.memory_space<vmem>>, vector<16x1xf32>,
    return
  }
  func.func @transform_0(%arg0: i32) -> (i32, i32) {
    %c0_i32 = arith.constant 0 : i32
    %c0_i32_0 = arith.constant 0 : i32
    return %arg0, %c0_i32 : i32, i32
  }
  func.func @transform_1(%arg0: i32) -> (i32, i32) {
    %c0_i32 = arith.constant 0 : i32
    %c0_i32_0 = arith.constant 0 : i32
    return %arg0, %c0_i32 : i32, i32
  }
  func.func @transform_2(%arg0: i32) -> (i32, i32) {
    %c0_i32 = arith.constant 0 : i32
    %c0_i32_0 = arith.constant 0 : i32
    %c0_i32_1 = arith.constant 0 : i32
    return %c0_i32, %c0_i32_0 : i32, i32
  }
  func.func @transform_3(%arg0: i32) -> (i32, i32) {
    %c0_i32 = arith.constant 0 : i32
    %c0_i32_0 = arith.constant 0 : i32
    %c0_i32_1 = arith.constant 0 : i32
    return %c0_i32, %c0_i32_0 : i32, i32
  }
  func.func @transform_4(%arg0: i32) -> (i32, i32) {
    %c0_i32 = arith.constant 0 : i32
    %c0_i32_0 = arith.constant 0 : i32
    %c0_i32_1 = arith.constant 0 : i32
    return %c0_i32, %c0_i32_0 : i32, i32
  }
  func.func @transform_5(%arg0: i32) -> (i32, i32) {
    %c0_i32 = arith.constant 0 : i32
    %c0_i32_0 = arith.constant 0 : i32
    %c0_i32_1 = arith.constant 0 : i32
    return %c0_i32, %c0_i32_0 : i32, i32
  }
  func.func @transform_6(%arg0: i32) -> i32 {
    %c0_i32 = arith.constant 0 : i32
    %c0_i32_0 = arith.constant 0 : i32
    return %c0_i32 : i32
  }
  func.func @transform_7(%arg0: i32) -> (i32, i32) {
    %c0_i32 = arith.constant 0 : i32
    %c0_i32_0 = arith.constant 0 : i32
    return %arg0, %c0_i32 : i32, i32
  }
}

</mosaic_0001>

<bundles_post_ra>
// kernel: tpu_custom_call.1
= control target key start
LH: loop header
LB: loop body
LE: loop exit
PB: predicated region body
PF: predicated region fallthrough
CT: control target
= control target key end

     0   :  { %13 = vsyncpa [#allocation4], 0  ;;  %s604_s0 = inlined_call_operand.hbm [shape: f32[16,32], index: 0, kind: input, shape index: {}]   ;;  %s605_s1 = inlined_call_operand.hbm [shape: f32[16,16], index: 1, kind: input, shape index: {}]   ;;  %s606_s2 = inlined_call_operand.hbm [shape: f32[32,64], index: 2, kind: input, shape index: {}]   ;;  %s607_s3 = inlined_call_operand.hbm [shape: f32[16,64], index: 3, kind: input, shape index: {}]   ;;  %s608_s4 = inlined_call_operand.vmem [shape: f32[1,64], index: 4, kind: input, shape index: {}]   ;;  %s609_s5 = inlined_call_operand.vmem [shape: f32[1,64], index: 5, kind: input, shape index: {}]   ;;  %s610_s6 = inlined_call_operand.<no memory space> [shape: f32[1], index: 6, kind: input, shape index: {}]   ;;  %s611_s7 = inlined_call_operand.vmem [shape: f32[16,1], index: 7, kind: output, shape index: {}]  }
   0x1   :  { %14 = vsyncpa [#allocation6], 0 }
   0x2   :  { %15 = vsyncpa [#allocation9], 0  ;;  %s467_s24 = smov [#allocation5]   ;;  %s468_s26 = smov [#allocation3]  }
   0x3   :  { %s33_s25 = sshll.u32 %s467_s24, 4  ;;  %s21_s27 = sshll.u32 %s468_s26, 4  ;;  %s34_s25 = int_to_ptr.vmem [resolvable:$true] %s33_s25  ;;  %s513_s27 = int_to_ptr.vmem [resolvable:$true] %s21_s27 }
   0x4   :  { %s373_s30 = scalar_lea.hbm %s605_s1, 256 }
   0x5   :  { %p374_p0 = scmp.ne.s32.totalorder %s605_s1, %s373_s30  ;;  %p377_p1 = scmp.lt.u32.totalorder %s373_s30, %s605_s1 }
   0x7   :  { %p379_p2 = pnand %p377_p1, %p374_p0 }
   0x9   :  { %382 = shalt.err (!%p379_p2)
}
   0xa   :  { %s383_s12 = scalar_lea.vmem %s34_s25, 256  ;;  %p388_p4 = scmp.lt.s32.totalorder %s34_s25, %s34_s25 }
   0xb   :  { %p384_p3 = scmp.ne.s32.totalorder %s34_s25, %s383_s12  ;;  %p389_p5 = scmp.lt.s32.totalorder %s383_s12, %s383_s12 }
   0xd   :  { %p390_p6 = por %p389_p5, %p388_p4 }
   0xf   :  { %p391_p7 = pnand %p390_p6, %p384_p3 }
  0x11   :  { %394 = shalt.err (!%p391_p7)
}
  0x12   :  { %s469_s13 = smov 128   ;;  %s470_s14 = smov 8  }
  0x13   :  { %39 = dma.hbm_to_vmem [thread:$0]  %s605_s1, 256, %s34_s25, [#allocation6], %s469_s13, %s469_s13, %s470_s14  }
  0x14   :  { %s395_s19 = scalar_lea.hbm %s604_s0, 256 }
  0x15   :  { %p396_p8 = scmp.ne.s32.totalorder %s604_s0, %s395_s19  ;;  %p399_p9 = scmp.lt.u32.totalorder %s395_s19, %s604_s0 }
  0x17   :  { %p401_p10 = pnand %p399_p9, %p396_p8 }
  0x19   :  { %404 = shalt.err (!%p401_p10)
}
  0x1a   :  { %s405_s24 = scalar_lea.vmem %s513_s27, 256  ;;  %p410_p12 = scmp.lt.s32.totalorder %s513_s27, %s513_s27 }
  0x1b   :  { %p406_p11 = scmp.ne.s32.totalorder %s513_s27, %s405_s24  ;;  %p411_p13 = scmp.lt.s32.totalorder %s405_s24, %s405_s24 }
  0x1d   :  { %p412_p0 = por %p411_p13, %p410_p12 }
  0x1f   :  { %p413_p1 = pnand %p412_p0, %p406_p11 }
  0x21   :  { %416 = shalt.err (!%p413_p1)
}
  0x22   :  { %27 = dma.hbm_to_vmem [thread:$0]  %s604_s0, 256, %s513_s27, [#allocation4], %s469_s13, %s469_s13, %s470_s14  }
  0x23   :  { %s471_s26 = smov [#allocation7]   ;;  %s472_s29 = smov [#allocation8]  }
  0x24   :  { %s45_s28 = sshll.u32 %s471_s26, 4  ;;  %s57_s30 = sshll.u32 %s472_s29, 4  ;;  %s46_s28 = int_to_ptr.vmem [resolvable:$true] %s45_s28  ;;  %s550_s30 = int_to_ptr.vmem [resolvable:$true] %s57_s30 }
  0x25   :  { %s417_s10 = scalar_lea.hbm %s606_s2, 512 }
  0x26   :  { %p418_p2 = scmp.ne.s32.totalorder %s606_s2, %s417_s10  ;;  %p421_p3 = scmp.lt.u32.totalorder %s417_s10, %s606_s2 }
  0x28   :  { %p423_p4 = pnand %p421_p3, %p418_p2 }
  0x2a   :  { %426 = shalt.err (!%p423_p4)
}
  0x2b   :  { %s427_s0 = scalar_lea.vmem %s46_s28, 512  ;;  %p432_p6 = scmp.lt.s32.totalorder %s46_s28, %s46_s28 }
  0x2c   :  { %p428_p5 = scmp.ne.s32.totalorder %s46_s28, %s427_s0  ;;  %p433_p7 = scmp.lt.s32.totalorder %s427_s0, %s427_s0 }
  0x2e   :  { %p434_p8 = por %p433_p7, %p432_p6 }
  0x30   :  { %p435_p9 = pnand %p434_p8, %p428_p5 }
  0x32   :  { %438 = shalt.err (!%p435_p9)
}
  0x33   :  { %51 = dma.hbm_to_vmem [thread:$0]  %s606_s2, 512, %s46_s28, [#allocation6], %s469_s13, %s469_s13, %s470_s14  }
  0x34   :  { %s439_s20 = scalar_lea.hbm %s607_s3, 256 }
  0x35   :  { %p440_p10 = scmp.ne.s32.totalorder %s607_s3, %s439_s20  ;;  %p443_p11 = scmp.lt.u32.totalorder %s439_s20, %s607_s3 }
  0x37   :  { %p445_p12 = pnand %p443_p11, %p440_p10 }
  0x39   :  { %448 = shalt.err (!%p445_p12)
}
  0x3a   :  { %s449_s1 = scalar_lea.vmem %s550_s30, 256  ;;  %p454_p0 = scmp.lt.s32.totalorder %s550_s30, %s550_s30 }
  0x3b   :  { %p450_p13 = scmp.ne.s32.totalorder %s550_s30, %s449_s1  ;;  %p455_p1 = scmp.lt.s32.totalorder %s449_s1, %s449_s1 }
  0x3d   :  { %p456_p2 = por %p455_p1, %p454_p0 }
  0x3f   :  { %p457_p3 = pnand %p456_p2, %p450_p13 }
  0x41   :  { %460 = shalt.err (!%p457_p3)
}
  0x42   :  { %63 = dma.hbm_to_vmem [thread:$0]  %s607_s3, 256, %s550_s30, [#allocation9], %s469_s13, %s469_s13, %s470_s14  }
  0x43   :  { %461 = dma.done.wait [#allocation4], 256  }
  0x44   :  { %462 = vsyncadd [#allocation4], 4294967040 }
  0x45   :  { %463 = dma.done.wait [#allocation6], 768  }
  0x46   :  { %464 = vsyncadd [#allocation6], 4294966528 }
  0x47   :  { %465 = dma.done.wait [#allocation9], 256  }
  0x48   :  { %466 = vsyncadd [#allocation9], 4294967040  ;;  %v84_v0 = vld [vmem:[#allocation7] sm:$0xff]  ;;  %v85_v1 = vld [vmem:[#allocation7 + $0x8] sm:$0xff]  ;;  %vm92_vm0 = vcmask 130048   ;;  %vm174_vm1 = vcmask 261120   ;;  %v284_v29 = vstv %s610_s6 }
  0x49   :  { %v90_v2 = vld [vmem:[#allocation8] sm:$0xff]  ;;  %v349_v3 = vpack.c.bf16 %v85_v1, %v84_v0  ;;  %v91_v4 = vld [vmem:[#allocation8 + $0x8] sm:$0xff]  ;;  %v86_v5 = vld [vmem:[#allocation7 + $0x10] sm:$0xff]  ;;  %vm276_vm2 = vcmask 523264   ;;  %vm299_vm3 = vcmask 7168  }
  0x4a   :  { %v87_v6 = vld [vmem:[#allocation7 + $0x18] sm:$0xff]  ;;  %v345_v7 = vpack.c.bf16 %v91_v4, %v90_v2  ;;  %v88_v9 = vld [vmem:[#allocation5] sm:$0xff]  ;;  %v82_v10 = vld [vmem:[#allocation3] sm:$0xff] }
  0x4b   :  { %v353_v8 = vpack.c.bf16 %v87_v6, %v86_v5  ;;  %350 = vmatprep.subr.bf16.mxu0 %v349_v3  ;;  %331 = vmatprep.mubr.msk.f32.mxu1 %vm92_vm0, %v88_v9  ;;  %v89_v11 = vld [vmem:[#allocation5 + $0x8] sm:$0xff]  ;;  %v83_v12 = vld [vmem:[#allocation3 + $0x8] sm:$0xff]  ;;  %v313_v16 = vld [vmem:[%s608_s4] ss:$0 sm:$0xff] }
  0x4c   :  { %352 = vmatpush3.bf16.msra.mxu0 %v349_v3  ;;  %346 = vmatprep.subr.bf16.mxu1 %v345_v7  ;;  %v314_v22 = vld [vmem:[%s609_s5] ss:$0 sm:$0xff] }
  0x4d   :  { %348 = vmatpush3.bf16.msra.mxu1 %v345_v7  ;;  %354 = vmatprep.subr.bf16.mxu0 %v353_v8 }
  0x4e   :  { %342 = vmatprep.mubr.msk.f32.mxu0 %vm174_vm1, %v82_v10 }
  0x50   :  { %356 = vmatpush3.bf16.msra.mxu0 %v353_v8  ;;  %332 = vmatmul.mubr.msk.f32.vlgmr.msra.gmra.mrb[0].mxu1 %vm92_vm0, %v89_v11 }
  0x53   :  { %343 = vmatmul.mubr.msk.f32.vlgmr.msra.gmra.mrb[0].mxu0 %vm174_vm1, %v83_v12 }
 0x123   :  { %v333_v13 = vpop.f32.mrb[0].mxu1 }
 0x124   :  { %v165_v14 = vpop.f32.mrb[1].mxu1 }
 0x126   :  { %v344_v15 = vpop.f32.mrb[0].mxu0 }
 0x127   :  { %v253_v17 = vadd.f32 %v344_v15, %v333_v13  ;;  %v247_v18 = vpop.f32.mrb[1].mxu0 }
 0x128   :  { %v248_v19 = vadd.f32 %v247_v18, %v165_v14 }
 0x129   :  { %v264_v20 = vadd.f32 %v313_v16, %v253_v17 }
 0x12a   :  { %v263_v21 = vadd.f32 %v313_v16, %v248_v19 }
 0x12b   :  { %v266_v23 = vmax.f32 %v264_v20, 0.0 }
 0x12c   :  { %v265_v24 = vmax.f32 %v263_v21, 0.0 }
 0x12d   :  { %v275_v27 = vmul.f32 %v314_v22, %v266_v23 }
 0x12e   :  { %v274_v25 = vmul.f32 %v314_v22, %v265_v24 }
 0x12f   :  { %v280_v28 = vsel %vm276_vm2, %v275_v27, 0.0 }
 0x130   :  { %v277_v26 = vsel %vm276_vm2, %v274_v25, 0.0 }
 0x131   :  { %278 = vadd.xlane.f32.xlu0 %v277_v26 }
 0x135   :  { %281 = vadd.xlane.f32.xlu0 %v280_v28 }
 0x1be   :  { %v279_v30 = vpop.xlane.xlu0 %278 }
 0x1bf   :  { %v285_v31 = vadd.f32 %v284_v29, %v279_v30 }
 0x1c1   :  { %v315_v32 = vmul.f32 -1.442695, %v285_v31 }
 0x1c2   :  { %v282_v33 = vpop.xlane.xlu0 %281 }
 0x1c3   :  { %365 = vpow2.f32 %v315_v32  ;;  %v286_v34 = vadd.f32 %v284_v29, %v282_v33 }
 0x1c5   :  { %v316_v35 = vmul.f32 -1.442695, %v286_v34 }
 0x1c7   :  { %367 = vpow2.f32 %v316_v35 }
 0x1cd   :  { %v366_v36 = vpop.eup %365 }
 0x1ce   :  { %v293_v37 = vadd.f32 1.0, %v366_v36 }
 0x1d0   :  { %369 = vrcp.f32 %v293_v37 }
 0x1d1   :  { %v368_v38 = vpop.eup %367 }
 0x1d2   :  { %v294_v39 = vadd.f32 1.0, %v368_v38 }
 0x1d4   :  { %371 = vrcp.f32 %v294_v39 }
 0x1da   :  { %v370_v40 = vpop.eup %369 }
 0x1db   :  { %300 = vst.msk [vmem:[%s611_s7] sm:$0xff] %vm299_vm3, %v370_v40 }
 0x1de   :  { %v372_v41 = vpop.eup %371 }
 0x1df   :  { %301 = vst.msk [vmem:[%s611_s7 + $0x8] sm:$0xff] %vm299_vm3, %v372_v41 }
 0x1e0   :  { %306 = vsyncpa [#allocation4], 1 }
 0x1e1   :  { %307 = vsyncpa [#allocation6], 1 }
 0x1e2   :  { %308 = vsyncpa [#allocation9], 1 }

</bundles_post_ra>
